<compile_context>
chip_gen: v7x
topology: tpu7x:2x2x1
jax: 0.10.0
libtpu: 0.0.40
codegen_flags: <defaults>
</compile_context>

<pallas_src>
import numpy as np
import jax
import jax.numpy as jnp
from jax.experimental import pallas as pl
from jax.experimental.pallas import tpu as pltpu

# Module constants (from VGGProcessing.__init__)
_MEAN = np.array([0.485, 0.456, 0.406], dtype=np.float32)
_STD = np.array([0.229, 0.224, 0.225], dtype=np.float32)


def _adaptive_pool_matrix(in_size: int, out_size: int) -> np.ndarray:
    """P[i, j] = 1/len(window_i) if j in window_i else 0 (PyTorch adaptive rule)."""
    P = np.zeros((out_size, in_size), dtype=np.float32)
    for i in range(out_size):
        start = (i * in_size) // out_size
        end = -((-(i + 1) * in_size) // out_size)  # ceil((i+1)*in/out)
        P[i, start:end] = 1.0 / (end - start)
    return P


def _vgg_kernel(phb_ref, pwtb_ref, scale_ref, bias_ref, x_ref, o_ref):
    # x_ref:     (B, H, W)      block of B image planes
    # phb_ref:   (B, OUT, H)    row-pooling matrix, broadcast over planes (resident)
    # pwtb_ref:  (B, W, OUT)    pre-transposed col-pooling matrix (resident)
    # scale_ref: (B, 1, 1)      per-plane scale  = 1 / (255 * std[c])
    # bias_ref:  (B, 1, 1)      per-plane bias   = -mean[c] / std[c]
    x = x_ref[...]                                                    # (B, H, W)
    # Stage 1: pool along W  ->  (B, H, OUT)
    t1 = jnp.einsum('bhw,bwo->bho', x, pwtb_ref[...],
                    preferred_element_type=jnp.float32)
    # Stage 2: pool along H  ->  (B, OUT, OUT)
    pooled = jnp.einsum('brh,bho->bro', phb_ref[...], t1,
                        preferred_element_type=jnp.float32)
    # Folded normalization:  (pooled/255 - mean) / std  ==  pooled*scale + bias
    o_ref[...] = pooled * scale_ref[...] + bias_ref[...]


def vgg_processing(image: jax.Array, out_size: int = 256,
                   block_planes: int = 8) -> jax.Array:
    """image: (N, C, H, W) float32 in [0, 255]. Returns (N, C, out_size, out_size)."""
    N, C, H, W = image.shape
    assert C == _MEAN.shape[0], "VGGProcessing expects 3 channels"
    NC = N * C

    # Keep at least 2 grid steps when possible (v7x has 2 TensorCores).
    B = max(1, min(block_planes, (NC + 1) // 2))
    grid = (pl.cdiv(NC, B),)

    # Host-side precompute: pooling matrices (P_w pre-transposed), broadcast to
    # the plane-block so the in-kernel contractions are plain batched matmuls.
    ph = _adaptive_pool_matrix(H, out_size)                         # (OUT, H)
    pw = _adaptive_pool_matrix(W, out_size)                         # (OUT, W)
    phb = jnp.asarray(np.ascontiguousarray(
        np.broadcast_to(ph, (B, out_size, H))))                     # (B, OUT, H)
    pwtb = jnp.asarray(np.ascontiguousarray(
        np.broadcast_to(pw.T, (B, W, out_size))))                   # (B, W, OUT)

    # Per-plane affine (channel pattern repeats every C planes).
    scale_c = (1.0 / (255.0 * _STD)).astype(np.float32)             # (C,)
    bias_c = (-_MEAN / _STD).astype(np.float32)                     # (C,)
    scale_p = jnp.asarray(np.tile(scale_c, N).reshape(NC, 1, 1))
    bias_p = jnp.asarray(np.tile(bias_c, N).reshape(NC, 1, 1))

    x = image.astype(jnp.float32).reshape(NC, H, W)                 # free reshape

    grid_spec = pltpu.PrefetchScalarGridSpec(
        num_scalar_prefetch=0,
        grid=grid,
        in_specs=[
            # Constant index maps -> DMA'd once, stay resident in VMEM.
            pl.BlockSpec((B, out_size, H), lambda p: (0, 0, 0)),
            pl.BlockSpec((B, W, out_size), lambda p: (0, 0, 0)),
            # Per-plane affine blocks.
            pl.BlockSpec((B, 1, 1), lambda p: (p, 0, 0)),
            pl.BlockSpec((B, 1, 1), lambda p: (p, 0, 0)),
            # Image planes, B per grid step.
            pl.BlockSpec((B, H, W), lambda p: (p, 0, 0)),
        ],
        out_specs=pl.BlockSpec((B, out_size, out_size), lambda p: (p, 0, 0)),
    )

    out = pl.pallas_call(
        _vgg_kernel,
        out_shape=jax.ShapeDtypeStruct((NC, out_size, out_size), jnp.float32),
        grid_spec=grid_spec,
        compiler_params=pltpu.CompilerParams(
            dimension_semantics=("parallel",)),
    )(phb, pwtb, scale_p, bias_p, x)

    return out.reshape(N, C, out_size, out_size)


def _reference(image: np.ndarray, out_size: int) -> np.ndarray:
    """Pure-numpy reference matching the PyTorch forward (explicit adaptive windows)."""
    N, C, H, W = image.shape
    img = image / 255.0
    out = np.zeros((N, C, out_size, out_size), dtype=np.float32)
    for i in range(out_size):
        hs, he = (i * H) // out_size, -((-(i + 1) * H) // out_size)
        for j in range(out_size):
            ws, we = (j * W) // out_size, -((-(j + 1) * W) // out_size)
            out[:, :, i, j] = img[:, :, hs:he, ws:we].mean(axis=(2, 3))
    return (out - _MEAN.reshape(1, C, 1, 1)) / _STD.reshape(1, C, 1, 1)


if __name__ == "__main__":
    key = jax.random.PRNGKey(0)
    N, C, H, W = 2, 3, 20, 20         # small, non-divisible into out_size=16
    OUT = 16
    image = jax.random.uniform(key, (N, C, H, W), dtype=jnp.float32,
                               minval=0.0, maxval=255.0)

    result = vgg_processing(image, out_size=OUT)
    result = jax.block_until_ready(result)

    ref = _reference(np.asarray(image), OUT)
    np.testing.assert_allclose(np.asarray(result), ref, rtol=1e-5, atol=1e-5)
    print("KERNEL_OK")
</pallas_src>

<mosaic_0001>
module attributes {stable_mosaic.version = 11 : i64} {
  func.func @_vgg_kernel(%arg0: i32, %arg1: memref<3x16x20xf32, #tpu.memory_space<vmem>>, %arg2: memref<3x20x16xf32, #tpu.memory_space<vmem>>, %arg3: memref<3x1x1xf32, #tpu.memory_space<vmem>>, %arg4: memref<3x1x1xf32, #tpu.memory_space<vmem>>, %arg5: memref<3x20x20xf32, #tpu.memory_space<vmem>>, %arg6: memref<3x16x16xf32, #tpu.memory_space<vmem>>) attributes {dimension_semantics = [#tpu.dimension_semantics<parallel>], iteration_bounds = array<i64: 2>, scalar_prefetch = 0 : i64, scratch_operands = 0 : i64, tpu.core_type = #tpu.core_type<tc>, window_params = [{pipeline_mode = #tpu.pipeline_mode<synchronous>, transform_indices = @transform_0, window_bounds = array<i64: 3, 16, 20>}, {pipeline_mode = #tpu.pipeline_mode<synchronous>, transform_indices = @transform_1, window_bounds = array<i64: 3, 20, 16>}, {transform_indices = @transform_2, window_bounds = array<i64: 3, 1, 1>}, {transform_indices = @transform_3, window_bounds = array<i64: 3, 1, 1>}, {transform_indices = @transform_4, window_bounds = array<i64: 3, 20, 20>}, {transform_indices = @transform_5, window_bounds = array<i64: 3, 16, 16>}]} {
    %c0 = arith.constant 0 : index
    %c0_0 = arith.constant 0 : index
    %c0_1 = arith.constant 0 : index
    %0 = vector.load %arg5[%c0, %c0_0, %c0_1] : memref<3x20x20xf32, #tpu.memory_space<vmem>>, vector<3x20x20xf32>
    %c0_2 = arith.constant 0 : index
    %c0_3 = arith.constant 0 : index
    %c0_4 = arith.constant 0 : index
    %1 = vector.load %arg2[%c0_2, %c0_3, %c0_4] : memref<3x20x16xf32, #tpu.memory_space<vmem>>, vector<3x20x16xf32>
    "tpu.trace_start"() <{level = 10 : i32, message = "bhw,bwo->bho"}> : () -> ()
    %cst = arith.constant dense<0.000000e+00> : vector<3x20x16xf32>
    %2 = tpu.matmul %0, %1, %cst {dimension_numbers = #tpu.dot_dimension_numbers<[2], [1], [1], [2], [0, 0, 0, 1, 1, 2], [0], [0]>} : vector<3x20x20xf32>, vector<3x20x16xf32>, vector<3x20x16xf32> -> vector<3x20x16xf32>
    "tpu.trace_stop"() : () -> ()
    %c0_5 = arith.constant 0 : index
    %c0_6 = arith.constant 0 : index
    %c0_7 = arith.constant 0 : index
    %3 = vector.load %arg1[%c0_5, %c0_6, %c0_7] : memref<3x16x20xf32, #tpu.memory_space<vmem>>, vector<3x16x20xf32>
    "tpu.trace_start"() <{level = 10 : i32, message = "brh,bho->bro"}> : () -> ()
    %cst_8 = arith.constant dense<0.000000e+00> : vector<3x16x16xf32>
    %4 = tpu.matmul %3, %2, %cst_8 {dimension_numbers = #tpu.dot_dimension_numbers<[2], [1], [1], [2], [0, 0, 0, 1, 1, 2], [0], [0]>} : vector<3x16x20xf32>, vector<3x20x16xf32>, vector<3x16x16xf32> -> vector<3x16x16xf32>
    "tpu.trace_stop"() : () -> ()
    %c0_9 = arith.constant 0 : index
    %c0_10 = arith.constant 0 : index
    %c0_11 = arith.constant 0 : index
    %5 = vector.load %arg3[%c0_9, %c0_10, %c0_11] : memref<3x1x1xf32, #tpu.memory_space<vmem>>, vector<3x1x1xf32>
    %6 = vector.broadcast %5 : vector<3x1x1xf32> to vector<3x16x16xf32>
    %7 = arith.mulf %4, %6 : vector<3x16x16xf32>
    %c0_12 = arith.constant 0 : index
    %c0_13 = arith.constant 0 : index
    %c0_14 = arith.constant 0 : index
    %8 = vector.load %arg4[%c0_12, %c0_13, %c0_14] : memref<3x1x1xf32, #tpu.memory_space<vmem>>, vector<3x1x1xf32>
    %9 = vector.broadcast %8 : vector<3x1x1xf32> to vector<3x16x16xf32>
    %10 = arith.addf %7, %9 : vector<3x16x16xf32>
    %c0_15 = arith.constant 0 : index
    %c0_16 = arith.constant 0 : index
    %c0_17 = arith.constant 0 : index
    %11 = vector.load %arg6[%c0_15, %c0_16, %c0_17] : memref<3x16x16xf32, #tpu.memory_space<vmem>>, vector<3x16x16xf32>
    tpu.vector_store %arg6[%c0_15, %c0_16, %c0_17], %10 {strides = array<i32>} : memref<3x16x16xf32, #tpu.memory_space<vmem>>, vector<3x16x16xf32>,
    return
  }
  func.func @transform_0(%arg0: i32) -> (i32, i32, i32) {
    %c0_i32 = arith.constant 0 : i32
    %c0_i32_0 = arith.constant 0 : i32
    %c0_i32_1 = arith.constant 0 : i32
    %c0_i32_2 = arith.constant 0 : i32
    return %c0_i32, %c0_i32_0, %c0_i32_1 : i32, i32, i32
  }
  func.func @transform_1(%arg0: i32) -> (i32, i32, i32) {
    %c0_i32 = arith.constant 0 : i32
    %c0_i32_0 = arith.constant 0 : i32
    %c0_i32_1 = arith.constant 0 : i32
    %c0_i32_2 = arith.constant 0 : i32
    return %c0_i32, %c0_i32_0, %c0_i32_1 : i32, i32, i32
  }
  func.func @transform_2(%arg0: i32) -> (i32, i32, i32) {
    %c0_i32 = arith.constant 0 : i32
    %c0_i32_0 = arith.constant 0 : i32
    %c0_i32_1 = arith.constant 0 : i32
    return %arg0, %c0_i32, %c0_i32_0 : i32, i32, i32
  }
  func.func @transform_3(%arg0: i32) -> (i32, i32, i32) {
    %c0_i32 = arith.constant 0 : i32
    %c0_i32_0 = arith.constant 0 : i32
    %c0_i32_1 = arith.constant 0 : i32
    return %arg0, %c0_i32, %c0_i32_0 : i32, i32, i32
  }
  func.func @transform_4(%arg0: i32) -> (i32, i32, i32) {
    %c0_i32 = arith.constant 0 : i32
    %c0_i32_0 = arith.constant 0 : i32
    %c0_i32_1 = arith.constant 0 : i32
    return %arg0, %c0_i32, %c0_i32_0 : i32, i32, i32
  }
  func.func @transform_5(%arg0: i32) -> (i32, i32, i32) {
    %c0_i32 = arith.constant 0 : i32
    %c0_i32_0 = arith.constant 0 : i32
    %c0_i32_1 = arith.constant 0 : i32
    return %arg0, %c0_i32, %c0_i32_0 : i32, i32, i32
  }
}

</mosaic_0001>

<bundles_post_ra>
// kernel: tpu_custom_call.1
= control target key start
LH: loop header
LB: loop body
LE: loop exit
PB: predicated region body
PF: predicated region fallthrough
CT: control target
= control target key end

     0   :  { %10 = vsyncpa [#allocation3], 0  ;;  %s1616_s0 = inlined_call_operand.hbm [shape: f32[3,16,20], index: 0, kind: input, shape index: {}]   ;;  %s1617_s1 = inlined_call_operand.vmem [shape: f32[3,20,16], index: 1, kind: input, shape index: {}]   ;;  %s1618_s2 = inlined_call_operand.vmem [shape: f32[6,1,1], index: 2, kind: input, shape index: {}]   ;;  %s1619_s3 = inlined_call_operand.vmem [shape: f32[6,1,1], index: 3, kind: input, shape index: {}]   ;;  %s1620_s4 = inlined_call_operand.vmem [shape: f32[6,20,20], index: 4, kind: input, shape index: {}]   ;;  %s1621_s5 = inlined_call_operand.hbm [shape: f32[6,16,16], index: 5, kind: output, shape index: {}]  }
   0x1   :  { %11 = vsyncpa [#allocation4], 0 }
   0x2   :  { %13 = vsyncpa [#allocation4 + $0x1], 0  ;;  %s1387_s18 = smov 0   ;;  %s1389_s19 = smov 0  }
   0x3   :  { %s1391_s20 = smov 0   ;;  %s1393_s21 = smov 0  }
   0x4 LB: > { %s1408_s22 = sadd.s32 4294967295, %s1345_s21   ;;  %s1022_s23 = sadd.s32 4294967294, %s1345_s21   ;;  %s1345_s21 = sphi %s1393_s21, %s1637_s21   ;;  %s1341_s20 = sphi %s1391_s20, %s1636_s20   ;;  %s1337_s19 = sphi %s1389_s19, %s1635_s19   ;;  %s1333_s18 = sphi %s1387_s18, %s1634_s18  }
   0x5   : > { %s1412_s24 = sadd.s32 1, %s1345_s21   ;;  %s146_s25 = sadd.s32 1, %s1341_s20 }
   0x6   : > { %s143_s26 = ssub.s32 %s1345_s21, %s1412_s24  ;;  %p156_p0 = scmp.ne.s32.totalorder %s1341_s20, %s1337_s19 }
   0x7   : > { %p144_p1 = scmp.eq.s32.totalorder %s143_s26, 0  ;;  %p157_p2 = scmp.eq.s32.totalorder %s1408_s22, 1 }
   0x8   : > { %p162_p3 = scmp.ne.s32.totalorder %s1337_s19, %s1333_s18  ;;  %p163_p4 = scmp.eq.s32.totalorder %s1022_s23, 1 }
   0x9   : > { %s1423_s27 = scalar_select %p144_p1, %s1341_s20, %s146_s25  }
   0xa   : > { %p1425_p5 = por %p157_p2, %p156_p0  ;;  %p1429_p6 = por %p163_p4, %p162_p3 }
   0xb   : > { %p1023_p7 = scmp.ge.s32.totalorder %s1345_s21, 1  ;;  %p170_p8 = scmp.lt.s32.totalorder %s1345_s21, 3 }
   0xc   : > { %s1625_s28 = scalar_select %p1425_p5, 1, 0 }
   0xd   : > { %s1626_s29 = scalar_select %p1429_p6, 1, 0 }
   0xe   : > { %p1622_p9 = scmp.eq.s32.totalorder %s1408_s22, 0  ;;  %p1436_p10 = pnand %p1023_p7, %p170_p8 }
   0xf   : > { %s1347_s6 = smov [#allocation2]   ;;  %s1251_s11 = scalar_lea.hbm %s1616_s0, 768 }
  0x10   : > { %s1627_s30 = scalar_select %p1436_p10, 1, 0 }
  0x11   : > { %s182_s7 = sshll.u32 %s1347_s6, 4  ;;  %p1197_p11 = pneg %p1436_p10  ;;  %s183_s7 = int_to_ptr.vmem [resolvable:$true] %s182_s7 }
  0x12   : > { %p1252_p13 = scmp.ne.s32.totalorder %s1616_s0, %s1251_s11  ;;  %p1258_p3 = scmp.lt.u32.totalorder %s1251_s11, %s1616_s0 }
  0x13   : > { %p1444_p12 = pnand %p1622_p9, %p1197_p11 }
  0x15   : > { %p1253_p0 = pneg %p1444_p12 }
  0x17   : > { %p1254_p1 = pnand %p1253_p0, %p1252_p13 }
  0x19   : > { %p1255_p2 = pneg %p1254_p1 }
  0x1b   : > { %p1260_p4 = pnand %p1258_p3, %p1255_p2 }
  0x1d   : > { %1263 = shalt.err (!%p1260_p4)
}
  0x1e   : > { %s1264_s16 = scalar_lea.vmem %s183_s7, 768  ;;  %p1272_p9 = scmp.lt.s32.totalorder %s183_s7, %s183_s7 }
  0x1f   : > { %p1265_p7 = scmp.ne.s32.totalorder %s183_s7, %s1264_s16  ;;  %p1273_p6 = scmp.lt.s32.totalorder %s1264_s16, %s1264_s16 }
  0x21   : > { %p1267_p8 = pnand %p1265_p7, %p1253_p0  ;;  %p1274_p5 = por %p1273_p6, %p1272_p9 }
  0x23   : > { %p1268_p11 = pneg %p1267_p8 }
  0x25   : > { %p1275_p10 = pnand %p1274_p5, %p1268_p11 }
  0x27   : > { %1278 = shalt.err (!%p1275_p10)
}
  0x28   : > { %s1348_s17 = smov 128   ;;  %s1349_s23 = smov 8  }
  0x29   : > { %1200 = dma.hbm_to_vmem [thread:$0]  (!%p1444_p12), %s1616_s0, 768, %s183_s7, [#allocation3], %s1348_s17, %s1348_s17, %s1349_s23  }
  0x2a   : > { %p1629_p13 = scmp.ne.s32.totalorder %s1627_s30, 0 }
  0x2b   : > { %p1630_p1 = scmp.eq.s32.totalorder (!%p1629_p13), %s1408_s22, 0 }
  0x2c   : > { %227 = sbr.rel (%p1629_p13) target bundleno = 529 (0x211), region = 40 }
  0x33   : > { %1324 = dma.done.wait (%p1630_p1), [#allocation3], 768   ;;  %p1631_p0 = pmov %p1630_p1 }
  0x34   : > { %v1350_v0 = vmov 0.0|0.0   ;;  %vm1351_vm0 = vmmov 0   ;;  %v1352_v1 = vmov 0.0   ;;  %s264_s6 = smul.u32 3, %s1408_s22  ;;  %v291_v2 = vld [vmem:[%s1617_s1] sm:$0xff]  ;;  %v292_v3 = vld [vmem:[%s1617_s1 + $0x8] sm:$0xff] }
  0x35   : > { %1326 = vsyncadd (%p1631_p0), [#allocation3], 4294966528  ;;  %1168 = vmatprep.subr.bf16.mxu0 %v1350_v0  ;;  %1102 = vmatprep.mubr.msk.f32.mxu0 %vm1351_vm0, %v1352_v1  ;;  %v1169_v4 = vpack.c.bf16 %v292_v3, %v291_v2  ;;  %v294_v5 = vld [vmem:[%s1617_s1 + $0x18] sm:$0xff]  ;;  %v295_v6 = vld [vmem:[%s1617_s1 + $0x20] sm:$0xff]  ;;  %vm310_vm1 = vcmask 1043456   ;;  %vm300_vm2 = vcmask 162816  }
  0x36   : > { %1171 = vmatprep.subr.bf16.mxu1 %v1350_v0  ;;  %1117 = vmatprep.mubr.msk.f32.mxu1 %vm1351_vm0, %v1352_v1  ;;  %p265_p5 = scmp.lt.s32.totalorder %s264_s6, 5  ;;  %v1172_v7 = vpack.c.bf16 %v295_v6, %v294_v5  ;;  %v297_v8 = vld [vmem:[%s1617_s1 + $0x30] sm:$0xff]  ;;  %v298_v9 = vld [vmem:[%s1617_s1 + $0x38] sm:$0xff]  ;;  %v296_v13 = vld [vmem:[%s1617_s1 + $0x28] sm:$0xf]  ;;  %v1353_v25 = vmov 0  }
  0x37   : > { %1170 = vmatpush3.bf16.msra.mxu0 %v1169_v4  ;;  %v293_v10 = vld [vmem:[%s1617_s1 + $0x10] sm:$0xf]  ;;  %v1175_v12 = vpack.c.bf16 %v298_v9, %v297_v8  ;;  %v299_v16 = vld [vmem:[%s1617_s1 + $0x40] sm:$0xf]  ;;  %1250 = vset.pattern.permute.xlu1 %v1353_v25  ;;  %v579_v44 = vld [vmem:[#allocation2 + $0x8] sm:$0xff]  ;;  %vm908_vm3 = vcmask 130048  }
  0x38   : > { %s1639_s6 = smov (!%p265_p5, %s264_s6), 5  ;;  %1100 = vmatprep.subr.mxu0 %v1352_v1  ;;  %1173 = vmatpush3.bf16.msra.mxu1 %v1172_v7  ;;  %v578_v23 = vld [vmem:[#allocation2] sm:$0xff]  ;;  %v580_v46 = vld [vmem:[#allocation2 + $0x10] sm:$0xff]  ;;  %v581_v51 = vld [vmem:[#allocation2 + $0x18] sm:$0xff]  ;;  %s1062_s30 = smul.u32 768, %s1408_s22 }
  0x39   : > { %s1190_s10 = smul.u32 24, %s1639_s6  ;;  %1115 = vmatprep.subr.mxu1 %v1352_v1  ;;  %v582_v24 = vld [vmem:[#allocation2 + $0x20] sm:$0xff]  ;;  %s267_s15 = scalar_lea.vmem %s1618_s2, %s1639_s6  ;;  %1249 = vset.pattern.permute.xlu0 %v1353_v25  ;;  %v583_v56 = vld [vmem:[#allocation2 + $0x28] sm:$0xff] }
  0x3a   : > { %s272_s25 = scalar_lea.vmem %s1619_s3, %s1639_s6  ;;  %v1052_v26 = vld [vmem:[%s267_s15 + $0x2] ss:$0 sm:$0xff]  ;;  %v1050_v27 = vld [vmem:[%s267_s15] ss:$0 sm:$0xff]  ;;  %v1051_v29 = vld [vmem:[%s267_s15 + $0x1] ss:$0 sm:$0xff] }
  0x3b   : > { %s1491_s17 = scalar_lea.vmem %s1620_s4, %s1190_s10  ;;  %1101 = vmatpush3.msk.msra.mxu0 %vm310_vm1, %v293_v10  ;;  %863 = vperm.xlu1 %1250, %v1052_v26   ;;  %v1053_v28 = vld [vmem:[%s272_s25] ss:$0 sm:$0xff]  ;;  %v1055_v30 = vld [vmem:[%s272_s25 + $0x2] ss:$0 sm:$0xff]  ;;  %v1054_v31 = vld [vmem:[%s272_s25 + $0x1] ss:$0 sm:$0xff]  ;;  %s1569_s10 = scalar_lea.hbm %s1621_s5, %s1062_s30 }
  0x3c   : > { %v282_v11 = vld [vmem:[%s1491_s17] sm:$0xff]  ;;  %1174 = vmatprep.subr.bf16.mxu0 %v1350_v0  ;;  %v285_v14 = vld [vmem:[%s1491_s17 + $0x18] sm:$0xff]  ;;  %v283_v15 = vld [vmem:[%s1491_s17 + $0x8] sm:$0xff]  ;;  %1116 = vmatpush3.msk.msra.mxu1 %vm310_vm1, %v296_v13  ;;  %s261_s6 = sand.u32 1, %s1337_s19   ;;  %p1632_p9 = scmp.ne.s32.totalorder %s1625_s28, 0 }
  0x3d   : > { %1103 = vmatmul.mubr.msk.f32.vlgmr.msra.gmra.mrb[0].mxu0 %vm300_vm2, %v282_v11  ;;  %1118 = vmatmul.mubr.msk.f32.vlgmr.msra.gmra.mrb[0].mxu1 %vm300_vm2, %v285_v14  ;;  %v286_v17 = vld [vmem:[%s1491_s17 + $0x20] sm:$0xff]  ;;  %v284_v18 = vld [vmem:[%s1491_s17 + $0x10] sm:$0xf]  ;;  %v287_v19 = vld [vmem:[%s1491_s17 + $0x28] sm:$0xf]  ;;  %s1575_s22 = scalar_lea.sflag [#allocation4], %s261_s6 }
  0x3e   : > { %1105 = vmatprep.mubr.msk.f32.mxu0 %vm1351_vm0, %v1352_v1  ;;  %1176 = vmatpush3.bf16.msra.mxu0 %v1175_v12  ;;  %v288_v20 = vld [vmem:[%s1491_s17 + $0x30] sm:$0xff]  ;;  %v289_v21 = vld [vmem:[%s1491_s17 + $0x38] sm:$0xff]  ;;  %v290_v22 = vld [vmem:[%s1491_s17 + $0x40] sm:$0xf]  ;;  %s1189_s17 = smul.u32 48, %s261_s6  ;;  %s1354_s12 = smov [#allocation5]  }
  0x3f   : > { %1130 = vmatprep.subr.mxu0 %v1352_v1  ;;  %1120 = vmatprep.mubr.msk.f32.mxu1 %vm1351_vm0, %v1352_v1  ;;  %s1283_s13 = sshll.u32 %s1354_s12, 4  ;;  %s1284_s13 = int_to_ptr.vmem [resolvable:$false] %s1283_s13 }
  0x40   : > { %855 = vperm.xlu0 %1249, %v1050_v27   ;;  %891 = vperm.xlu1 %1250, %v1053_v28   ;;  %s263_s26 = scalar_lea.vmem [#allocation5], %s1189_s17  ;;  %s1285_s14 = scalar_lea.vmem %s1284_s13, 1536 }
  0x41   : > { %1106 = vmatmul.mubr.msk.f32.gmra.mrb[2].mxu0 %vm300_vm2, %v283_v15  ;;  %1121 = vmatmul.mubr.msk.f32.gmra.mrb[2].mxu1 %vm300_vm2, %v286_v17  ;;  %s930_s7 = sshll.u32 %s263_s26, 4  ;;  %s1564_s7 = int_to_ptr.vmem [resolvable:$true] %s930_s7 }
  0x42   : > { %1108 = vmatprep.mubr.msk.f32.mxu0 %vm1351_vm0, %v1352_v1  ;;  %1131 = vmatpush3.msk.msra.mxu0 %vm310_vm1, %v299_v16  ;;  %s1279_s11 = scalar_lea.vmem %s1564_s7, 768  ;;  %p1286_p2 = scmp.lt.s32.totalorder %s1564_s7, %s1284_s13 }
  0x43   : > { %1123 = vmatprep.mubr.msk.f32.mxu1 %vm1351_vm0, %v1352_v1  ;;  %p1280_p6 = scmp.ne.s32.totalorder %s1564_s7, %s1279_s11  ;;  %p1287_p3 = scmp.lt.s32.totalorder %s1285_s14, %s1279_s11 }
  0x44   : > { %859 = vperm.xlu0 %1249, %v1051_v29   ;;  %899 = vperm.xlu1 %1250, %v1055_v30  }
  0x45   : > { %1109 = vmatmul.mubr.msk.f32.gmra.mrb[4].mxu0 %vm300_vm2, %v284_v18  ;;  %1124 = vmatmul.mubr.msk.f32.gmra.mrb[4].mxu1 %vm300_vm2, %v287_v19  ;;  %p1281_p10 = pnand %p1280_p6, %p1632_p9  ;;  %p1288_p4 = por %p1287_p3, %p1286_p2 }
  0x46   : > { %1132 = vmatprep.mubr.msk.f32.mxu0 %vm1351_vm0, %v1352_v1  ;;  %1147 = vmatprep.mubr.msk.f32.mxu1 %vm300_vm2, %v578_v23 }
  0x47   : > { %p1282_p12 = pneg %p1281_p10 }
  0x48   : > { %895 = vperm.xlu0 %1249, %v1054_v31  }
  0x49   : > { %1133 = vmatmul.mubr.msk.f32.vlgmr.msra.gmra.mrb[6].mxu0 %vm300_vm2, %v288_v20  ;;  %p1289_p7 = pnand %p1288_p4, %p1282_p12 }
  0x4a   : > { %1135 = vmatprep.mubr.msk.f32.mxu0 %vm1351_vm0, %v1352_v1 }
  0x4d   : > { %1136 = vmatmul.mubr.msk.f32.gmra.mrb[8].mxu0 %vm300_vm2, %v289_v21 }
  0x4e   : > { %1138 = vmatprep.mubr.msk.f32.mxu0 %vm1351_vm0, %v1352_v1 }
  0x51   : > { %1139 = vmatmul.mubr.msk.f32.gmra.mrb[10].mxu0 %vm300_vm2, %v290_v22 }
  0x52   : > { %1165 = vmatprep.mubr.msk.f32.mxu0 %vm300_vm2, %v582_v24 }
  0xba   : > { %v864_v58 = vpop.permute.xlu1 %863 }
  0xbf   : > { %v856_v57 = vpop.permute.xlu0 %855  ;;  %v892_v63 = vpop.permute.xlu1 %891 }
  0xc3   : > { %v860_v60 = vpop.permute.xlu0 %859  ;;  %v900_v14 = vpop.permute.xlu1 %899 }
  0xc7   : > { %v896_v4 = vpop.permute.xlu0 %895 }
 0x110   : > { %v380_v32 = vpop.f32.mrb[0].mxu0  ;;  %v472_v34 = vpop.f32.mrb[0].mxu1 }
 0x111   : > { %v1104_v33 = vpop.f32.mrb[1].mxu0  ;;  %v1119_v36 = vpop.f32.mrb[1].mxu1 }
 0x114   : > { %v385_v35 = vpop.f32.mrb[2].mxu0  ;;  %v477_v39 = vpop.f32.mrb[2].mxu1 }
 0x115   : > { %v1177_v37 = vpack.c.bf16 %v385_v35, %v380_v32  ;;  %v1107_v38 = vpop.f32.mrb[3].mxu0  ;;  %v1181_v41 = vpack.c.bf16 %v477_v39, %v472_v34  ;;  %v1122_v42 = vpop.f32.mrb[3].mxu1 }
 0x117   : > { %1178 = vmatprep.subr.bf16.mxu1 %v1177_v37 }
 0x118   : > { %v390_v40 = vpop.f32.mrb[4].mxu0  ;;  %1180 = vmatpush3.bf16.msra.mxu1 %v1177_v37  ;;  %v482_v45 = vpop.f32.mrb[4].mxu1 }
 0x119   : > { %v1110_v43 = vpop.f32.mrb[5].mxu0  ;;  %1145 = vmatprep.subr.msk.mxu1 %vm310_vm1, %v390_v40  ;;  %v1125_v48 = vpop.f32.mrb[5].mxu1 }
 0x11c   : > { %v564_v47 = vpop.f32.mrb[6].mxu0  ;;  %1146 = vmatpush3.msk.msra.mxu1 %vm310_vm1, %v390_v40 }
 0x11d   : > { %v1134_v49 = vpop.f32.mrb[7].mxu0  ;;  %1182 = vmatprep.subr.bf16.mxu1 %v1181_v41  ;;  %1148 = vmatmul.mubr.msk.f32.vlgmr.msra.gmra.mrb[6].mxu1 %vm300_vm2, %v579_v44 }
 0x11e   : > { %1184 = vmatpush3.bf16.msra.mxu1 %v1181_v41  ;;  %1156 = vmatprep.mubr.msk.f32.mxu1 %vm300_vm2, %v580_v46 }
 0x11f   : > { %1154 = vmatprep.subr.msk.mxu1 %vm310_vm1, %v482_v45 }
 0x120   : > { %v569_v50 = vpop.f32.mrb[8].mxu0 }
 0x121   : > { %v1185_v52 = vpack.c.bf16 %v569_v50, %v564_v47  ;;  %v1137_v53 = vpop.f32.mrb[9].mxu0 }
 0x122   : > { %1155 = vmatpush3.msk.msra.mxu1 %vm310_vm1, %v482_v45 }
 0x123   : > { %1186 = vmatprep.subr.bf16.mxu0 %v1185_v52  ;;  %1157 = vmatmul.mubr.msk.f32.vlgmr.msra.gmra.mrb[8].mxu1 %vm300_vm2, %v581_v51 }
 0x124   : > { %1188 = vmatpush3.bf16.msra.mxu0 %v1185_v52  ;;  %v574_v54 = vpop.f32.mrb[10].mxu0 }
 0x125   : > { %1163 = vmatprep.subr.msk.mxu0 %vm310_vm1, %v574_v54  ;;  %v1140_v55 = vpop.f32.mrb[11].mxu0 }
 0x128   : > { %1164 = vmatpush3.msk.msra.mxu0 %vm310_vm1, %v574_v54 }
 0x129   : > { %1166 = vmatmul.mubr.msk.f32.vlgmr.msra.gmra.mrb[12].mxu0 %vm300_vm2, %v583_v56 }
 0x1f0   : > { %v1149_v59 = vpop.f32.mrb[6].mxu1 }
 0x1f1   : > { %v867_v61 = vmul.f32 %v1149_v59, %v856_v57  ;;  %v659_v62 = vpop.f32.mrb[7].mxu1 }
 0x1f2   : > { %v866_v0 = vmul.f32 %v856_v57, %v659_v62 }
 0x1f3   : > { %v903_v1 = vadd.f32 %v892_v63, %v867_v61 }
 0x1f4   : > { %v902_v2 = vadd.f32 %v892_v63, %v866_v0 }
 0x1f5   : > { %910 = vst.msk [vmem:[%s263_s26 + $0x8] sm:$0xff] %vm908_vm3, %v903_v1 }
 0x1f6   : > { %909 = vst.msk [vmem:[%s263_s26] sm:$0xff] %vm908_vm3, %v902_v2  ;;  %v1158_v3 = vpop.f32.mrb[8].mxu1 }
 0x1f7   : > { %v869_v5 = vmul.f32 %v1158_v3, %v860_v60  ;;  %v743_v6 = vpop.f32.mrb[9].mxu1 }
 0x1f8   : > { %v868_v7 = vmul.f32 %v860_v60, %v743_v6 }
 0x1f9   : > { %v905_v8 = vadd.f32 %v896_v4, %v869_v5 }
 0x1fa   : > { %v904_v9 = vadd.f32 %v896_v4, %v868_v7 }
 0x1fb   : > { %912 = vst.msk [vmem:[%s263_s26 + $0x18] sm:$0xff] %vm908_vm3, %v905_v8 }
 0x1fc   : > { %v1167_v10 = vpop.f32.mrb[12].mxu0  ;;  %911 = vst.msk [vmem:[%s263_s26 + $0x10] sm:$0xff] %vm908_vm3, %v904_v9 }
 0x1fd   : > { %v871_v11 = vmul.f32 %v1167_v10, %v864_v58  ;;  %v827_v12 = vpop.f32.mrb[13].mxu0 }
 0x1fe   : > { %v870_v13 = vmul.f32 %v864_v58, %v827_v12 }
 0x1ff   : > { %v907_v15 = vadd.f32 %v900_v14, %v871_v11 }
 0x200   : > { %v906_v16 = vadd.f32 %v900_v14, %v870_v13 }
 0x201   : > { %914 = vst.msk [vmem:[%s263_s26 + $0x28] sm:$0xff] %vm908_vm3, %v907_v15 }
 0x202   : > { %913 = vst.msk [vmem:[%s263_s26 + $0x20] sm:$0xff] %vm908_vm3, %v906_v16 }
 0x203   : > { %1292 = shalt.err (!%p1289_p7)
}
 0x204   : > { %s1293_s15 = scalar_lea.hbm %s1569_s10, 768  ;;  %s1297_s25 = scalar_lea.hbm %s1621_s5, 1536 }
 0x205   : > { %p1294_p8 = scmp.ne.s32.totalorder %s1569_s10, %s1293_s15  ;;  %p1298_p1 = scmp.lt.u32.totalorder %s1569_s10, %s1621_s5 }
 0x206   : > { %p1299_p0 = scmp.lt.u32.totalorder %s1297_s25, %s1293_s15  ;;  %p1301_p6 = scmp.lt.u32.totalorder %s1293_s15, %s1569_s10 }
 0x207   : > { %p1295_p11 = pnand %p1294_p8, %p1632_p9 }
 0x208   : > { %p1300_p5 = por %p1299_p0, %p1298_p1 }
 0x209   : > { %p1296_p13 = pneg %p1295_p11 }
 0x20a   : > { %p1302_p10 = por %p1301_p6, %p1300_p5 }
 0x20c   : > { %p1303_p12 = pnand %p1302_p10, %p1296_p13 }
 0x20e   : > { %1306 = shalt.err (!%p1303_p12)
}
 0x20f   : > { %s1355_s26 = smov 128   ;;  %s1356_s30 = smov 8  }
 0x210   : > { %1195 = dma.vmem_to_hbm [thread:$0]  (%p1632_p9), %s1564_s7, 768, %s1569_s10, %s1575_s22, %s1355_s26, %s1355_s26, %s1356_s30  }
 0x211 PF: > { %p1207_p2 = scmp.ge.s32.totalorder %s1345_s21, 2  ;;  %s945_s8 = sand.u32 1, %s1333_s18  }
 0x212   : > { %p1633_p3 = scmp.ne.s32.totalorder %s1626_s29, 0  ;;  %s946_s9 = scalar_lea.sflag [#allocation4], %s945_s8 }
 0x214   : > { %p1202_p4 = pnand %p1207_p2, %p1633_p3 }
 0x216   : > { %1328 = dma.done.wait (!%p1202_p4), %s946_s9, 768  }
 0x217   : > { %1330 = vsyncadd (!%p1202_p4), %s946_s9, 4294966528  ;;  %p16_p7 = scmp.ge.s32.totalorder %s1412_s24, 4   ;;  %s1634_s18 = smov %s1337_s19 }
 0x218   : > { %s1635_s19 = smov %s1341_s20  ;;  %s1636_s20 = smov %s1423_s27 }
 0x219   : > { %s1637_s21 = smov %s1412_s24  ;;  %18 = sbr.rel (!%p16_p7) target bundleno = 4 (0x4), region = 86 }
 0x220   :  { %951 = vsyncpa [#allocation3], 1 }
 0x221   :  { %953 = vsyncpa [#allocation3 + $0x1], 1 }
 0x222   :  { %954 = vsyncpa [#allocation4], 1 }
 0x223   :  { %956 = vsyncpa [#allocation4 + $0x1], 1 }

</bundles_post_ra>
